<compile_context>
chip_gen: v7x
topology: tpu7x:2x2x1
jax: 0.10.0
libtpu: 0.0.40
codegen_flags: <defaults>
</compile_context>

<pallas_src>
import functools

import jax
import jax.numpy as jnp
from jax.experimental import pallas as pl
from jax.experimental.pallas import tpu as pltpu

LANES = 128


def ddpg_critic_kernel(s_ref, a_ref, w1s_ref, w1a_ref, b1_ref,
                       w2_ref, b2_ref, w3_ref, b3_ref, o_ref):
    """Three Linear layers + ReLUs; concat folded into two layer-1 dots."""
    s = s_ref[...]
    a = a_ref[...]

    # Layer 1: cat([s, a]) @ W1 + b1 -> ReLU   (== s @ W1[:S] + a @ W1[S:]).
    h1 = (jnp.dot(s, w1s_ref[...], preferred_element_type=jnp.float32)
          + jnp.dot(a, w1a_ref[...], preferred_element_type=jnp.float32)
          + b1_ref[...])
    h1 = jnp.maximum(h1, 0.0)

    # Layer 2: Linear + ReLU (lhs cast to weight dtype -> native MXU path).
    h2 = jnp.dot(h1.astype(w2_ref.dtype), w2_ref[...],
                 preferred_element_type=jnp.float32) + b2_ref[...]
    h2 = jnp.maximum(h2, 0.0)

    # Layer 3: Q head, lane-padded to 128 outputs (only lane 0 is real).
    q = jnp.dot(h2.astype(w3_ref.dtype), w3_ref[...],
                preferred_element_type=jnp.float32) + b3_ref[...]
    o_ref[...] = q.astype(o_ref.dtype)


def _round_up(x, m):
    return ((x + m - 1) // m) * m


def prepare_params(params, state_dim, *, matmul_dtype=jnp.bfloat16):
    """One-time weight prep: lane-pad hidden/output widths, split W1 for the
    folded concat, cast matmul operands.  Call once, reuse across forwards."""
    w1, b1, w2, b2, w3, b3 = params
    S = state_dim
    H = w1.shape[1]
    HP = _round_up(H, LANES)
    pad_h = HP - H

    w1p = jnp.pad(w1, ((0, 0), (0, pad_h)))
    b1p = jnp.pad(b1.reshape(1, -1), ((0, 0), (0, pad_h)))
    w2p = jnp.pad(w2, ((0, pad_h), (0, pad_h)))
    b2p = jnp.pad(b2.reshape(1, -1), ((0, 0), (0, pad_h)))
    # Lane-dense Q head: (H, 1) -> (HP, 128); zero-padding keeps numerics exact.
    w3p = jnp.pad(w3, ((0, pad_h), (0, LANES - 1)))
    b3p = jnp.pad(b3.reshape(1, -1), ((0, 0), (0, LANES - 1)))

    mm = lambda x: x.astype(matmul_dtype)
    return (mm(w1p[:S]), mm(w1p[S:]), b1p.astype(jnp.float32),
            mm(w2p), b2p.astype(jnp.float32),
            mm(w3p), b3p.astype(jnp.float32))


@functools.partial(jax.jit, static_argnames=("batch_tile", "matmul_dtype"))
def ddpg_critic_forward(state, action, prepared, *, batch_tile=2048,
                        matmul_dtype=jnp.bfloat16):
    """Q(state, action): state [B, S], action [B, A] -> [B, 1]."""
    w1s, w1a, b1, w2, b2, w3, b3 = prepared
    B, S = state.shape
    _, A = action.shape
    HP = w2.shape[0]

    # Matmul operands in matmul_dtype (no-op if the caller already passes it).
    s_in = state.astype(matmul_dtype)
    a_in = action.astype(matmul_dtype)

    # Batch tile: multiple of 8 sublanes; split into >=2 tiles when B >= 16 so
    # a 2-TensorCore chip (v7x) gets work on both cores via "parallel".
    if B >= 16:
        tb = min(batch_tile, _round_up(pl.cdiv(B, 2), 8))
    else:
        tb = B
    grid = (pl.cdiv(B, tb),)

    # VMEM budget: lane-padded double-buffered input/output tiles plus the
    # single-buffered resident weights, with headroom.  Clamp to 64 MiB (v7x
    # physical); raise above v5e's 16 MiB scoped default when tiles need it.
    itemsize = jnp.dtype(matmul_dtype).itemsize
    vmem_bytes = (
        2 * 2 * tb * LANES * itemsize                              # state+action tiles x2 buffers
        + 2 * tb * LANES * 4                                       # f32 output tile x2 buffers
        + (S * HP + A * HP + HP * HP + HP * LANES) * itemsize      # weights (single-buffered)
        + 4 * 8 * LANES * 4                                        # biases (sublane-padded, f32)
        + (4 << 20))                                               # headroom
    vmem_limit = int(min(max(vmem_bytes, 16 << 20), 64 << 20))

    def resident(shape):
        # Constant index_map: DMA'd once, VMEM-resident; one buffer suffices.
        return pl.BlockSpec(shape, lambda i: (0, 0),
                            pipeline_mode=pl.Buffered(1))

    out = pl.pallas_call(
        ddpg_critic_kernel,
        out_shape=jax.ShapeDtypeStruct((B, LANES), jnp.float32),
        grid=grid,
        in_specs=[
            pl.BlockSpec((tb, S), lambda i: (i, 0)),    # state batch tile
            pl.BlockSpec((tb, A), lambda i: (i, 0)),    # action batch tile
            resident((S, HP)), resident((A, HP)), resident((1, HP)),   # layer 1
            resident((HP, HP)), resident((1, HP)),                      # layer 2
            resident((HP, LANES)), resident((1, LANES)),                # Q head
        ],
        out_specs=pl.BlockSpec((tb, LANES), lambda i: (i, 0)),
        compiler_params=pltpu.CompilerParams(
            dimension_semantics=("parallel",),          # v7x: tiles over 2 TCs
            vmem_limit_bytes=vmem_limit),
    )(s_in, a_in, w1s, w1a, b1, w2, b2, w3, b3)

    return out[:, :1]   # real Q is lane 0 of the lane-dense output


def init_params(key, state_dim, action_dim, net_width):
    """PyTorch default Linear init: U[-1/sqrt(fan_in), +1/sqrt(fan_in)]."""
    keys = jax.random.split(key, 6)

    def lin(kw, kb, fan_in, fan_out):
        bound = 1.0 / jnp.sqrt(jnp.float32(fan_in))
        w = jax.random.uniform(kw, (fan_in, fan_out), jnp.float32, -bound, bound)
        b = jax.random.uniform(kb, (1, fan_out), jnp.float32, -bound, bound)
        return w, b

    w1, b1 = lin(keys[0], keys[1], state_dim + action_dim, net_width)
    w2, b2 = lin(keys[2], keys[3], net_width, net_width)
    w3, b3 = lin(keys[4], keys[5], net_width, 1)
    return (w1, b1, w2, b2, w3, b3)


if __name__ == "__main__":
    # Small shapes consistent with the module's forward(state, action).
    batch, state_dim, action_dim, net_width = 2, 16, 4, 32

    key = jax.random.PRNGKey(0)
    k_s, k_a, k_p = jax.random.split(key, 3)
    state = jax.random.normal(k_s, (batch, state_dim), dtype=jnp.float32)
    action = jax.random.normal(k_a, (batch, action_dim), dtype=jnp.float32)
    params = init_params(k_p, state_dim, action_dim, net_width)

    # Pure-JAX reference (identical math on the unpadded weights).
    w1, b1, w2, b2, w3, b3 = params
    sa = jnp.concatenate([state, action], axis=1)
    h1 = jnp.maximum(sa @ w1 + b1, 0.0)
    h2 = jnp.maximum(h1 @ w2 + b2, 0.0)
    ref = h2 @ w3 + b3

    # Exactness check: f32 matmul operands.
    prep_f32 = prepare_params(params, state_dim, matmul_dtype=jnp.float32)
    q = ddpg_critic_forward(state, action, prep_f32, matmul_dtype=jnp.float32)
    q = jax.block_until_ready(q)
    assert q.shape == (batch, 1)
    assert jnp.allclose(q, ref, atol=1e-5, rtol=1e-5)

    # Production path: bf16 matmul operands, f32 accumulation (loose tolerance).
    prep_bf16 = prepare_params(params, state_dim)
    q_bf16 = jax.block_until_ready(ddpg_critic_forward(state, action, prep_bf16))
    assert q_bf16.shape == (batch, 1)
    assert jnp.allclose(q_bf16, ref, atol=5e-2, rtol=5e-2)

    print("KERNEL_OK")
</pallas_src>

<mosaic_0001>
module attributes {stable_mosaic.version = 11 : i64} {
  func.func @ddpg_critic_kernel(%arg0: i32, %arg1: memref<2x16xf32, #tpu.memory_space<vmem>>, %arg2: memref<2x4xf32, #tpu.memory_space<vmem>>, %arg3: memref<16x128xf32, #tpu.memory_space<vmem>>, %arg4: memref<4x128xf32, #tpu.memory_space<vmem>>, %arg5: memref<1x128xf32, #tpu.memory_space<vmem>>, %arg6: memref<128x128xf32, #tpu.memory_space<vmem>>, %arg7: memref<1x128xf32, #tpu.memory_space<vmem>>, %arg8: memref<128x128xf32, #tpu.memory_space<vmem>>, %arg9: memref<1x128xf32, #tpu.memory_space<vmem>>, %arg10: memref<2x128xf32, #tpu.memory_space<vmem>>) attributes {dimension_semantics = [#tpu.dimension_semantics<parallel>], iteration_bounds = array<i64: 1>, scalar_prefetch = 0 : i64, scratch_operands = 0 : i64, tpu.core_type = #tpu.core_type<tc>, window_params = [{transform_indices = @transform_0, window_bounds = array<i64: 2, 16>}, {transform_indices = @transform_1, window_bounds = array<i64: 2, 4>}, {pipeline_mode = #tpu.pipeline_mode<synchronous>, transform_indices = @transform_2, window_bounds = array<i64: 16, 128>}, {pipeline_mode = #tpu.pipeline_mode<synchronous>, transform_indices = @transform_3, window_bounds = array<i64: 4, 128>}, {pipeline_mode = #tpu.pipeline_mode<synchronous>, transform_indices = @transform_4, window_bounds = array<i64: 1, 128>}, {pipeline_mode = #tpu.pipeline_mode<synchronous>, transform_indices = @transform_5, window_bounds = array<i64: 128, 128>}, {pipeline_mode = #tpu.pipeline_mode<synchronous>, transform_indices = @transform_6, window_bounds = array<i64: 1, 128>}, {pipeline_mode = #tpu.pipeline_mode<synchronous>, transform_indices = @transform_7, window_bounds = array<i64: 128, 128>}, {pipeline_mode = #tpu.pipeline_mode<synchronous>, transform_indices = @transform_8, window_bounds = array<i64: 1, 128>}, {transform_indices = @transform_9, window_bounds = array<i64: 2, 128>}]} {
    %c0 = arith.constant 0 : index
    %c0_0 = arith.constant 0 : index
    %0 = vector.load %arg1[%c0, %c0_0] : memref<2x16xf32, #tpu.memory_space<vmem>>, vector<2x16xf32>
    %c0_1 = arith.constant 0 : index
    %c0_2 = arith.constant 0 : index
    %1 = vector.load %arg2[%c0_1, %c0_2] : memref<2x4xf32, #tpu.memory_space<vmem>>, vector<2x4xf32>
    %c0_3 = arith.constant 0 : index
    %c0_4 = arith.constant 0 : index
    %2 = vector.load %arg3[%c0_3, %c0_4] : memref<16x128xf32, #tpu.memory_space<vmem>>, vector<16x128xf32>
    %cst = arith.constant dense<0.000000e+00> : vector<2x128xf32>
    %3 = tpu.matmul %0, %2, %cst {dimension_numbers = #tpu.dot_dimension_numbers<[1], [0], [0], [1], [0, 0, 1, 1], [], []>} : vector<2x16xf32>, vector<16x128xf32>, vector<2x128xf32> -> vector<2x128xf32>
    %c0_5 = arith.constant 0 : index
    %c0_6 = arith.constant 0 : index
    %4 = vector.load %arg4[%c0_5, %c0_6] : memref<4x128xf32, #tpu.memory_space<vmem>>, vector<4x128xf32>
    %cst_7 = arith.constant dense<0.000000e+00> : vector<2x128xf32>
    %5 = tpu.matmul %1, %4, %cst_7 {dimension_numbers = #tpu.dot_dimension_numbers<[1], [0], [0], [1], [0, 0, 1, 1], [], []>} : vector<2x4xf32>, vector<4x128xf32>, vector<2x128xf32> -> vector<2x128xf32>
    %6 = arith.addf %3, %5 : vector<2x128xf32>
    %c0_8 = arith.constant 0 : index
    %c0_9 = arith.constant 0 : index
    %7 = vector.load %arg5[%c0_8, %c0_9] : memref<1x128xf32, #tpu.memory_space<vmem>>, vector<1x128xf32>
    %8 = vector.broadcast %7 : vector<1x128xf32> to vector<2x128xf32>
    %9 = arith.addf %6, %8 : vector<2x128xf32>
    %cst_10 = arith.constant 0.000000e+00 : f32
    %10 = vector.broadcast %cst_10 : f32 to vector<2x128xf32>
    %11 = arith.maximumf %9, %10 : vector<2x128xf32>
    %c0_11 = arith.constant 0 : index
    %c0_12 = arith.constant 0 : index
    %12 = vector.load %arg6[%c0_11, %c0_12] : memref<128x128xf32, #tpu.memory_space<vmem>>, vector<128x128xf32>
    %cst_13 = arith.constant dense<0.000000e+00> : vector<2x128xf32>
    %13 = tpu.matmul %11, %12, %cst_13 {dimension_numbers = #tpu.dot_dimension_numbers<[1], [0], [0], [1], [0, 0, 1, 1], [], []>} : vector<2x128xf32>, vector<128x128xf32>, vector<2x128xf32> -> vector<2x128xf32>
    %c0_14 = arith.constant 0 : index
    %c0_15 = arith.constant 0 : index
    %14 = vector.load %arg7[%c0_14, %c0_15] : memref<1x128xf32, #tpu.memory_space<vmem>>, vector<1x128xf32>
    %15 = vector.broadcast %14 : vector<1x128xf32> to vector<2x128xf32>
    %16 = arith.addf %13, %15 : vector<2x128xf32>
    %cst_16 = arith.constant 0.000000e+00 : f32
    %17 = vector.broadcast %cst_16 : f32 to vector<2x128xf32>
    %18 = arith.maximumf %16, %17 : vector<2x128xf32>
    %c0_17 = arith.constant 0 : index
    %c0_18 = arith.constant 0 : index
    %19 = vector.load %arg8[%c0_17, %c0_18] : memref<128x128xf32, #tpu.memory_space<vmem>>, vector<128x128xf32>
    %cst_19 = arith.constant dense<0.000000e+00> : vector<2x128xf32>
    %20 = tpu.matmul %18, %19, %cst_19 {dimension_numbers = #tpu.dot_dimension_numbers<[1], [0], [0], [1], [0, 0, 1, 1], [], []>} : vector<2x128xf32>, vector<128x128xf32>, vector<2x128xf32> -> vector<2x128xf32>
    %c0_20 = arith.constant 0 : index
    %c0_21 = arith.constant 0 : index
    %21 = vector.load %arg9[%c0_20, %c0_21] : memref<1x128xf32, #tpu.memory_space<vmem>>, vector<1x128xf32>
    %22 = vector.broadcast %21 : vector<1x128xf32> to vector<2x128xf32>
    %23 = arith.addf %20, %22 : vector<2x128xf32>
    %c0_22 = arith.constant 0 : index
    %c0_23 = arith.constant 0 : index
    %24 = vector.load %arg10[%c0_22, %c0_23] : memref<2x128xf32, #tpu.memory_space<vmem>>, vector<2x128xf32>
    tpu.vector_store %arg10[%c0_22, %c0_23], %23 {strides = array<i32>} : memref<2x128xf32, #tpu.memory_space<vmem>>, vector<2x128xf32>,
    return
  }
  func.func @transform_0(%arg0: i32) -> (i32, i32) {
    %c0_i32 = arith.constant 0 : i32
    %c0_i32_0 = arith.constant 0 : i32
    return %arg0, %c0_i32 : i32, i32
  }
  func.func @transform_1(%arg0: i32) -> (i32, i32) {
    %c0_i32 = arith.constant 0 : i32
    %c0_i32_0 = arith.constant 0 : i32
    return %arg0, %c0_i32 : i32, i32
  }
  func.func @transform_2(%arg0: i32) -> (i32, i32) {
    %c0_i32 = arith.constant 0 : i32
    %c0_i32_0 = arith.constant 0 : i32
    %c0_i32_1 = arith.constant 0 : i32
    return %c0_i32, %c0_i32_0 : i32, i32
  }
  func.func @transform_3(%arg0: i32) -> (i32, i32) {
    %c0_i32 = arith.constant 0 : i32
    %c0_i32_0 = arith.constant 0 : i32
    %c0_i32_1 = arith.constant 0 : i32
    return %c0_i32, %c0_i32_0 : i32, i32
  }
  func.func @transform_4(%arg0: i32) -> (i32, i32) {
    %c0_i32 = arith.constant 0 : i32
    %c0_i32_0 = arith.constant 0 : i32
    %c0_i32_1 = arith.constant 0 : i32
    return %c0_i32, %c0_i32_0 : i32, i32
  }
  func.func @transform_5(%arg0: i32) -> (i32, i32) {
    %c0_i32 = arith.constant 0 : i32
    %c0_i32_0 = arith.constant 0 : i32
    %c0_i32_1 = arith.constant 0 : i32
    return %c0_i32, %c0_i32_0 : i32, i32
  }
  func.func @transform_6(%arg0: i32) -> (i32, i32) {
    %c0_i32 = arith.constant 0 : i32
    %c0_i32_0 = arith.constant 0 : i32
    %c0_i32_1 = arith.constant 0 : i32
    return %c0_i32, %c0_i32_0 : i32, i32
  }
  func.func @transform_7(%arg0: i32) -> (i32, i32) {
    %c0_i32 = arith.constant 0 : i32
    %c0_i32_0 = arith.constant 0 : i32
    %c0_i32_1 = arith.constant 0 : i32
    return %c0_i32, %c0_i32_0 : i32, i32
  }
  func.func @transform_8(%arg0: i32) -> (i32, i32) {
    %c0_i32 = arith.constant 0 : i32
    %c0_i32_0 = arith.constant 0 : i32
    %c0_i32_1 = arith.constant 0 : i32
    return %c0_i32, %c0_i32_0 : i32, i32
  }
  func.func @transform_9(%arg0: i32) -> (i32, i32) {
    %c0_i32 = arith.constant 0 : i32
    %c0_i32_0 = arith.constant 0 : i32
    return %arg0, %c0_i32 : i32, i32
  }
}

</mosaic_0001>

<bundles_post_ra>
// kernel: ddpg_critic_forward.1
= control target key start
LH: loop header
LB: loop body
LE: loop exit
PB: predicated region body
PF: predicated region fallthrough
CT: control target
= control target key end

     0   :  { %14 = vsyncpa [#allocation3], 0  ;;  %s882_s0 = inlined_call_operand.hbm [shape: f32[2,16], index: 0, kind: input, shape index: {}]   ;;  %s883_s1 = inlined_call_operand.vmem [shape: f32[2,4], index: 1, kind: input, shape index: {}]   ;;  %s884_s2 = inlined_call_operand.hbm [shape: f32[16,128], index: 2, kind: input, shape index: {}]   ;;  %s885_s3 = inlined_call_operand.vmem [shape: f32[4,128], index: 3, kind: input, shape index: {}]   ;;  %s886_s4 = inlined_call_operand.vmem [shape: f32[1,128], index: 4, kind: input, shape index: {}]   ;;  %s887_s5 = inlined_call_operand.hbm [shape: f32[128,128], index: 5, kind: input, shape index: {}]   ;;  %s888_s6 = inlined_call_operand.vmem [shape: f32[1,128], index: 6, kind: input, shape index: {}]   ;;  %s889_s7 = inlined_call_operand.hbm [shape: f32[128,128], index: 7, kind: input, shape index: {}]   ;;  %s890_s8 = inlined_call_operand.vmem [shape: f32[1,128], index: 8, kind: input, shape index: {}]   ;;  %s891_s9 = inlined_call_operand.vmem [shape: f32[2,128], index: 9, kind: output, shape index: {}]  }
   0x1   :  { %15 = vsyncpa [#allocation5], 0 }
   0x2   :  { %16 = vsyncpa [#allocation8], 0  ;;  %s727_s30 = smov [#allocation4]   ;;  %s633_s13 = scalar_lea.hbm %s884_s2, 256 }
   0x3   :  { %s34_s10 = sshll.u32 %s727_s30, 4  ;;  %p634_p0 = scmp.ne.s32.totalorder %s884_s2, %s633_s13  ;;  %s35_s10 = int_to_ptr.vmem [resolvable:$true] %s34_s10 }
   0x4   :  { %p637_p1 = scmp.lt.u32.totalorder %s633_s13, %s884_s2 }
   0x6   :  { %p639_p2 = pnand %p637_p1, %p634_p0 }
   0x8   :  { %642 = shalt.err (!%p639_p2)
}
   0x9   :  { %s643_s18 = scalar_lea.vmem %s35_s10, 256  ;;  %p648_p4 = scmp.lt.s32.totalorder %s35_s10, %s35_s10 }
   0xa   :  { %p644_p3 = scmp.ne.s32.totalorder %s35_s10, %s643_s18  ;;  %p649_p5 = scmp.lt.s32.totalorder %s643_s18, %s643_s18 }
   0xc   :  { %p650_p6 = por %p649_p5, %p648_p4 }
   0xe   :  { %p651_p7 = pnand %p650_p6, %p644_p3 }
  0x10   :  { %654 = shalt.err (!%p651_p7)
}
  0x11   :  { %s728_s19 = smov 128   ;;  %s729_s20 = smov 8  }
  0x12   :  { %40 = dma.hbm_to_vmem [thread:$0]  %s884_s2, 256, %s35_s10, [#allocation5], %s728_s19, %s728_s19, %s729_s20  }
  0x13   :  { %s730_s23 = smov [#allocation2]   ;;  %s731_s25 = smov [#allocation6]  }
  0x14   :  { %s23_s24 = sshll.u32 %s730_s23, 4  ;;  %s50_s26 = sshll.u32 %s731_s25, 4  ;;  %s24_s24 = int_to_ptr.vmem [resolvable:$true] %s23_s24  ;;  %s51_s26 = int_to_ptr.vmem [resolvable:$true] %s50_s26 }
  0x15   :  { %s655_s29 = scalar_lea.hbm %s882_s0, 32 }
  0x16   :  { %p656_p8 = scmp.ne.s32.totalorder %s882_s0, %s655_s29  ;;  %p659_p9 = scmp.lt.u32.totalorder %s655_s29, %s882_s0 }
  0x18   :  { %p661_p10 = pnand %p659_p9, %p656_p8 }
  0x1a   :  { %664 = shalt.err (!%p661_p10)
}
  0x1b   :  { %s665_s2 = scalar_lea.vmem %s24_s24, 32  ;;  %p670_p12 = scmp.lt.s32.totalorder %s24_s24, %s24_s24 }
  0x1c   :  { %p666_p11 = scmp.ne.s32.totalorder %s24_s24, %s665_s2  ;;  %p671_p13 = scmp.lt.s32.totalorder %s665_s2, %s665_s2 }
  0x1e   :  { %p672_p0 = por %p671_p13, %p670_p12 }
  0x20   :  { %p673_p1 = pnand %p672_p0, %p666_p11 }
  0x22   :  { %676 = shalt.err (!%p673_p1)
}
  0x23   :  { %26 = dma.hbm_to_vmem [thread:$0]  %s882_s0, 32, %s24_s24, [#allocation3]  }
  0x24   :  { %s677_s17 = scalar_lea.hbm %s887_s5, 2048 }
  0x25   :  { %p678_p2 = scmp.ne.s32.totalorder %s887_s5, %s677_s17  ;;  %p681_p3 = scmp.lt.u32.totalorder %s677_s17, %s887_s5 }
  0x27   :  { %p683_p4 = pnand %p681_p3, %p678_p2 }
  0x29   :  { %686 = shalt.err (!%p683_p4)
}
  0x2a   :  { %s687_s25 = scalar_lea.vmem %s51_s26, 2048  ;;  %p692_p6 = scmp.lt.s32.totalorder %s51_s26, %s51_s26 }
  0x2b   :  { %p688_p5 = scmp.ne.s32.totalorder %s51_s26, %s687_s25  ;;  %p693_p7 = scmp.lt.s32.totalorder %s687_s25, %s687_s25 }
  0x2d   :  { %p694_p8 = por %p693_p7, %p692_p6 }
  0x2f   :  { %p695_p9 = pnand %p694_p8, %p688_p5 }
  0x31   :  { %698 = shalt.err (!%p695_p9)
}
  0x32   :  { %56 = dma.hbm_to_vmem [thread:$0]  %s887_s5, 2048, %s51_s26, [#allocation5], %s728_s19, %s728_s19, %s729_s20  }
  0x33   :  { %s732_s27 = smov [#allocation7]   ;;  %s699_s11 = scalar_lea.hbm %s889_s7, 2048 }
  0x34   :  { %s64_s28 = sshll.u32 %s732_s27, 4  ;;  %p700_p10 = scmp.ne.s32.totalorder %s889_s7, %s699_s11  ;;  %s65_s28 = int_to_ptr.vmem [resolvable:$true] %s64_s28 }
  0x35   :  { %p703_p11 = scmp.lt.u32.totalorder %s699_s11, %s889_s7 }
  0x37   :  { %p705_p12 = pnand %p703_p11, %p700_p10 }
  0x39   :  { %708 = shalt.err (!%p705_p12)
}
  0x3a   :  { %s709_s14 = scalar_lea.vmem %s65_s28, 2048  ;;  %p714_p0 = scmp.lt.s32.totalorder %s65_s28, %s65_s28 }
  0x3b   :  { %p710_p13 = scmp.ne.s32.totalorder %s65_s28, %s709_s14  ;;  %p715_p1 = scmp.lt.s32.totalorder %s709_s14, %s709_s14 }
  0x3d   :  { %p716_p2 = por %p715_p1, %p714_p0 }
  0x3f   :  { %p717_p3 = pnand %p716_p2, %p710_p13 }
  0x41   :  { %720 = shalt.err (!%p717_p3)
}
  0x42   :  { %70 = dma.hbm_to_vmem [thread:$0]  %s889_s7, 2048, %s65_s28, [#allocation8], %s728_s19, %s728_s19, %s729_s20  }
  0x43   :  { %721 = dma.done.wait [#allocation3], 32  }
  0x44   :  { %722 = vsyncadd [#allocation3], 4294967264 }
  0x45   :  { %723 = dma.done.wait [#allocation5], 2304  }
  0x46   :  { %724 = vsyncadd [#allocation5], 4294964992 }
  0x47   :  { %725 = dma.done.wait [#allocation8], 2048  }
  0x48   :  { %726 = vsyncadd [#allocation8], 4294965248  ;;  %v733_v0 = vmov 0.0|0.0   ;;  %v734_v1 = vmov 0.0   ;;  %vm735_vm0 = vmmov 0   ;;  %vm94_vm1 = vcmask 1043456  }
  0x49   :  { %573 = vmatprep.subr.bf16.mxu1 %v733_v0  ;;  %491 = vmatprep.subr.mxu0 %v734_v1  ;;  %vm90_vm2 = vcmask 31744   ;;  %v87_v2 = vld [vmem:[#allocation4] sm:$0xff]  ;;  %v88_v3 = vld [vmem:[#allocation4 + $0x8] sm:$0xff]  ;;  %v86_v6 = vld [vmem:[%s883_s1] sm:$0x3]  ;;  %vm168_vm3 = vcmask 130048  }
  0x4a   :  { %493 = vmatprep.mubr.msk.f32.mxu0 %vm735_vm0, %v734_v1  ;;  %500 = vmatprep.mubr.msk.f32.mxu1 %vm735_vm0, %v734_v1  ;;  %v89_v4 = vld [vmem:[%s885_s3] sm:$0xf]  ;;  %v574_v5 = vpack.c.bf16 %v88_v3, %v87_v2  ;;  %v251_v7 = vld [vmem:[#allocation6] sm:$0xff]  ;;  %v254_v10 = vld [vmem:[#allocation6 + $0x18] sm:$0xff] }
  0x4b   :  { %492 = vmatpush3.msk.msra.mxu0 %vm94_vm1, %v89_v4  ;;  %v252_v8 = vld [vmem:[#allocation6 + $0x8] sm:$0xff]  ;;  %v253_v9 = vld [vmem:[#allocation6 + $0x10] sm:$0xff]  ;;  %v255_v14 = vld [vmem:[#allocation6 + $0x20] sm:$0xff] }
  0x4c   :  { %494 = vmatmul.mubr.msk.f32.vlgmr.msra.gmra.mrb[0].mxu0 %vm90_vm2, %v86_v6  ;;  %576 = vmatprep.subr.bf16.mxu0 %v733_v0  ;;  %v85_v11 = vld [vmem:[#allocation2] sm:$0x3]  ;;  %v577_v12 = vpack.c.bf16 %v252_v8, %v251_v7  ;;  %v580_v13 = vpack.c.bf16 %v254_v10, %v253_v9  ;;  %v257_v17 = vld [vmem:[#allocation6 + $0x30] sm:$0xff]  ;;  %v258_v18 = vld [vmem:[#allocation6 + $0x38] sm:$0xff] }
  0x4d   :  { %575 = vmatpush3.bf16.msra.mxu1 %v574_v5  ;;  %535 = vmatprep.mubr.msk.f32.mxu0 %vm735_vm0, %v734_v1  ;;  %v256_v15 = vld [vmem:[#allocation6 + $0x28] sm:$0xff]  ;;  %v586_v19 = vpack.c.bf16 %v258_v18, %v257_v17  ;;  %v259_v20 = vld [vmem:[#allocation6 + $0x40] sm:$0xff]  ;;  %v261_v23 = vld [vmem:[#allocation6 + $0x50] sm:$0xff] }
  0x4e   :  { %600 = vmatprep.subr.bf16.mxu1 %v733_v0  ;;  %578 = vmatpush3.bf16.msra.mxu0 %v577_v12  ;;  %v583_v16 = vpack.c.bf16 %v256_v15, %v255_v14  ;;  %v260_v21 = vld [vmem:[#allocation6 + $0x48] sm:$0xff]  ;;  %v262_v24 = vld [vmem:[#allocation6 + $0x58] sm:$0xff]  ;;  %v263_v26 = vld [vmem:[#allocation6 + $0x60] sm:$0xff] }
  0x4f   :  { %579 = vmatprep.subr.bf16.mxu0 %v733_v0  ;;  %v589_v22 = vpack.c.bf16 %v260_v21, %v259_v20  ;;  %v592_v25 = vpack.c.bf16 %v262_v24, %v261_v23  ;;  %v264_v27 = vld [vmem:[#allocation6 + $0x68] sm:$0xff]  ;;  %v265_v29 = vld [vmem:[#allocation6 + $0x70] sm:$0xff]  ;;  %v266_v30 = vld [vmem:[#allocation6 + $0x78] sm:$0xff] }
  0x50   :  { %501 = vmatmul.mubr.msk.f32.vlgmr.msra.gmra.mrb[0].mxu1 %vm168_vm3, %v85_v11  ;;  %v595_v28 = vpack.c.bf16 %v264_v27, %v263_v26  ;;  %v598_v31 = vpack.c.bf16 %v266_v30, %v265_v29  ;;  %v345_v32 = vld [vmem:[#allocation7] sm:$0xff]  ;;  %v346_v33 = vld [vmem:[#allocation7 + $0x8] sm:$0xff]  ;;  %v347_v34 = vld [vmem:[#allocation7 + $0x10] sm:$0xff] }
  0x51   :  { %570 = vmatprep.mubr.msk.f32.mxu1 %vm735_vm0, %v734_v1  ;;  %v601_v35 = vpack.c.bf16 %v346_v33, %v345_v32  ;;  %v348_v36 = vld [vmem:[#allocation7 + $0x18] sm:$0xff]  ;;  %v349_v38 = vld [vmem:[#allocation7 + $0x20] sm:$0xff]  ;;  %v350_v39 = vld [vmem:[#allocation7 + $0x28] sm:$0xff] }
  0x52   :  { %581 = vmatpush3.bf16.msra.mxu0 %v580_v13  ;;  %v604_v37 = vpack.c.bf16 %v348_v36, %v347_v34  ;;  %v607_v40 = vpack.c.bf16 %v350_v39, %v349_v38  ;;  %v351_v41 = vld [vmem:[#allocation7 + $0x30] sm:$0xff]  ;;  %v352_v42 = vld [vmem:[#allocation7 + $0x38] sm:$0xff]  ;;  %v353_v44 = vld [vmem:[#allocation7 + $0x40] sm:$0xff] }
  0x53   :  { %582 = vmatprep.subr.bf16.mxu0 %v733_v0  ;;  %602 = vmatpush3.bf16.msra.mxu1 %v601_v35  ;;  %v610_v43 = vpack.c.bf16 %v352_v42, %v351_v41  ;;  %v354_v45 = vld [vmem:[#allocation7 + $0x48] sm:$0xff]  ;;  %v355_v47 = vld [vmem:[#allocation7 + $0x50] sm:$0xff]  ;;  %v356_v48 = vld [vmem:[#allocation7 + $0x58] sm:$0xff] }
  0x54   :  { %603 = vmatprep.subr.bf16.mxu1 %v733_v0  ;;  %v613_v46 = vpack.c.bf16 %v354_v45, %v353_v44  ;;  %v616_v49 = vpack.c.bf16 %v356_v48, %v355_v47  ;;  %v357_v50 = vld [vmem:[#allocation7 + $0x60] sm:$0xff]  ;;  %v358_v51 = vld [vmem:[#allocation7 + $0x68] sm:$0xff]  ;;  %v359_v61 = vld [vmem:[#allocation7 + $0x70] sm:$0xff] }
  0x55   :  { %v619_v52 = vpack.c.bf16 %v358_v51, %v357_v50  ;;  %v449_v56 = vld [vmem:[%s886_s4] ss:$0 sm:$0xff]  ;;  %v360_v62 = vld [vmem:[#allocation7 + $0x78] sm:$0xff] }
  0x56   :  { %584 = vmatpush3.bf16.msra.mxu0 %v583_v16  ;;  %v622_v63 = vpack.c.bf16 %v360_v62, %v359_v61  ;;  %v451_v5 = vld [vmem:[%s890_s8] ss:$0 sm:$0xff] }
  0x57   :  { %585 = vmatprep.subr.bf16.mxu0 %v733_v0  ;;  %605 = vmatpush3.bf16.msra.mxu1 %v604_v37 }
  0x58   :  { %606 = vmatprep.subr.bf16.mxu1 %v733_v0 }
  0x5a   :  { %587 = vmatpush3.bf16.msra.mxu0 %v586_v19 }
  0x5b   :  { %588 = vmatprep.subr.bf16.mxu0 %v733_v0  ;;  %608 = vmatpush3.bf16.msra.mxu1 %v607_v40 }
  0x5c   :  { %609 = vmatprep.subr.bf16.mxu1 %v733_v0 }
  0x5e   :  { %590 = vmatpush3.bf16.msra.mxu0 %v589_v22 }
  0x5f   :  { %591 = vmatprep.subr.bf16.mxu0 %v733_v0  ;;  %611 = vmatpush3.bf16.msra.mxu1 %v610_v43 }
  0x60   :  { %612 = vmatprep.subr.bf16.mxu1 %v733_v0 }
  0x62   :  { %593 = vmatpush3.bf16.msra.mxu0 %v592_v25 }
  0x63   :  { %594 = vmatprep.subr.bf16.mxu0 %v733_v0  ;;  %614 = vmatpush3.bf16.msra.mxu1 %v613_v46 }
  0x64   :  { %615 = vmatprep.subr.bf16.mxu1 %v733_v0 }
  0x66   :  { %596 = vmatpush3.bf16.msra.mxu0 %v595_v28 }
  0x67   :  { %597 = vmatprep.subr.bf16.mxu0 %v733_v0  ;;  %617 = vmatpush3.bf16.msra.mxu1 %v616_v49 }
  0x68   :  { %618 = vmatprep.subr.bf16.mxu1 %v733_v0 }
  0x6a   :  { %599 = vmatpush3.bf16.msra.mxu0 %v598_v31 }
  0x6b   :  { %620 = vmatpush3.bf16.msra.mxu1 %v619_v52 }
  0x6c   :  { %621 = vmatprep.subr.bf16.mxu1 %v733_v0  ;;  %v450_v0 = vld [vmem:[%s888_s6] ss:$0 sm:$0xff] }
  0x6f   :  { %623 = vmatpush3.bf16.msra.mxu1 %v622_v63 }
 0x11f   :  { %v164_v53 = vpop.f32.mrb[0].mxu0 }
 0x120   :  { %v495_v54 = vpop.f32.mrb[1].mxu0 }
 0x123   :  { %v238_v55 = vpop.f32.mrb[0].mxu1 }
 0x124   :  { %v239_v57 = vadd.f32 %v238_v55, %v164_v53  ;;  %v502_v58 = vpop.f32.mrb[1].mxu1 }
 0x126   :  { %v249_v59 = vadd.f32 %v449_v56, %v239_v57 }
 0x128   :  { %v250_v60 = vmax.f32 %v249_v59, 0.0 }
 0x12a   :  { %536 = vmatmul.mubr.f32.vlgmr.msra.gmra.mrb[2].mxu0 %v250_v60 }
 0x1fd   :  { %v340_v1 = vpop.f32.mrb[2].mxu0 }
 0x1fe   :  { %v341_v2 = vadd.f32 %v450_v0, %v340_v1  ;;  %v537_v3 = vpop.f32.mrb[3].mxu0 }
 0x200   :  { %v344_v4 = vmax.f32 %v341_v2, 0.0 }
 0x202   :  { %571 = vmatmul.mubr.f32.vlgmr.msra.gmra.mrb[2].mxu1 %v344_v4 }
 0x2d5   :  { %v434_v6 = vpop.f32.mrb[2].mxu1 }
 0x2d6   :  { %v435_v7 = vadd.f32 %v451_v5, %v434_v6  ;;  %v572_v8 = vpop.f32.mrb[3].mxu1 }
 0x2d8   :  { %438 = vst [vmem:[%s891_s9] sm:$0x3] %v435_v7 }
 0x2d9   :  { %443 = vsyncpa [#allocation3], 1 }
 0x2da   :  { %444 = vsyncpa [#allocation5], 1 }
 0x2db   :  { %445 = vsyncpa [#allocation8], 1 }

</bundles_post_ra>
